<compile_context>
chip_gen: v7x
topology: tpu7x:2x2x1
jax: 0.10.0
libtpu: 0.0.40
codegen_flags: <defaults>
</compile_context>

<pallas_src>
import math
import functools

import jax
import jax.numpy as jnp
from jax.experimental import pallas as pl
from jax.experimental.pallas import tpu as pltpu


def _default_vmem_limit():
    try:
        cap = pltpu.get_tpu_info().vmem_capacity_bytes
    except Exception:
        cap = 64 * 1024 * 1024  # conservative (v7x per-TC VMEM)
    # ~3/4 of physical, capped well below the 128 MiB parts.
    return max(32 * 1024 * 1024, min(cap * 3 // 4, 112 * 1024 * 1024))


VMEM_LIMIT = _default_vmem_limit()


# ----------------------------------------------------------------------------
# Kernels
# ----------------------------------------------------------------------------
def _linear_kernel(x_ref, w_ref, b_ref, o_ref):
    """One (row-tile, col-tile) of  y = x @ W + b.  x/W are bf16, accumulation f32."""
    y = jnp.dot(x_ref[...], w_ref[...], preferred_element_type=jnp.float32) + b_ref[...]
    o_ref[...] = y.astype(o_ref.dtype)


def _flash_attn_kernel(*refs, use_mask, causal, tq, tk):
    """Flash-style attention for one (batch*head, q-tile) over Lk tiles (grid axis 2).

    refs layout:
      use_mask: q_ref, k_ref, v_ref, bias_ref, o_ref, m_sc, l_sc, acc_sc
      else    : q_ref, k_ref, v_ref,           o_ref, m_sc, l_sc, acc_sc
    1/sqrt(d_k) is already folded into the Q projection, the mask is an additive bias.
    """
    if use_mask:
        q_ref, k_ref, v_ref, bias_ref, o_ref, m_sc, l_sc, acc_sc = refs
    else:
        q_ref, k_ref, v_ref, o_ref, m_sc, l_sc, acc_sc = refs
        bias_ref = None

    ki = pl.program_id(2)

    @pl.when(ki == 0)
    def _init():
        m_sc[...] = jnp.full(m_sc.shape, -1e30, jnp.float32)
        l_sc[...] = jnp.zeros(l_sc.shape, jnp.float32)
        acc_sc[...] = jnp.zeros(acc_sc.shape, jnp.float32)

    def _compute():
        q = q_ref[0]                                   # (tq, d_k) bf16, pre-scaled
        k = k_ref[0]                                   # (tk, d_k) bf16
        v = v_ref[0]                                   # (tk, d_k) bf16

        # QK^T on the MXU, f32 accumulation.
        s = jax.lax.dot_general(q, k, (((1,), (1,)), ((), ())),
                                preferred_element_type=jnp.float32)   # (tq, tk)
        if use_mask:
            # additive bias: 0 where kept, ~-1e9 where masked (mask==0)
            s = s + bias_ref[0]

        # online softmax update (elementwise math in f32)
        m_prev = m_sc[...]                                             # (tq, 1)
        m_new = jnp.maximum(m_prev, jnp.max(s, axis=-1, keepdims=True))
        alpha = jnp.exp(m_prev - m_new)
        p = jnp.exp(s - m_new)                                         # (tq, tk)
        l_sc[...] = alpha * l_sc[...] + jnp.sum(p, axis=-1, keepdims=True)
        acc_sc[...] = alpha * acc_sc[...] + jnp.dot(
            p.astype(jnp.bfloat16), v, preferred_element_type=jnp.float32)
        m_sc[...] = m_new

    if causal:
        # Skip K tiles that lie entirely above the diagonal (contribution is exactly 0
        # under the causal mask).  ki == 0 is never skipped, so init always runs.
        qi = pl.program_id(1)
        pl.when(ki * tk < (qi + 1) * tq)(_compute)
    else:
        _compute()

    @pl.when(ki == pl.num_programs(2) - 1)
    def _finalize():
        inv_l = pl.reciprocal(l_sc[...], approx=True)   # EUP path, one per row
        o_ref[0] = (acc_sc[...] * inv_l).astype(o_ref.dtype)
    # TODO(synk): nn.Dropout(p=0.1) on p_attn is treated as identity (eval mode).


# ----------------------------------------------------------------------------
# Pallas wrappers
# ----------------------------------------------------------------------------
def pallas_linear(x2d, w, b, *, out_dtype=jnp.bfloat16, tm=512, tn=512):
    """Tiled dense layer y = x @ W + b, bf16 inputs / f32 accumulation.

    Grid = (row tiles, dout tiles) so large (fused QKV) weights are never fully resident.
    """
    n, din = x2d.shape
    dout = w.shape[1]

    x2d = x2d.astype(jnp.bfloat16)
    w = w.astype(jnp.bfloat16)
    b = b.astype(jnp.float32).reshape(1, dout)

    tm = min(tm, n)
    n_pad = pl.cdiv(n, tm) * tm
    if n_pad != n:
        x2d = jnp.pad(x2d, ((0, n_pad - n), (0, 0)))

    tn_ = tn if (dout > tn and dout % tn == 0) else dout

    out = pl.pallas_call(
        _linear_kernel,
        out_shape=jax.ShapeDtypeStruct((n_pad, dout), out_dtype),
        grid=(n_pad // tm, dout // tn_),
        in_specs=[pl.BlockSpec((tm, din), lambda i, j: (i, 0)),
                  pl.BlockSpec((din, tn_), lambda i, j: (0, j)),
                  pl.BlockSpec((1, tn_), lambda i, j: (0, j))],
        out_specs=pl.BlockSpec((tm, tn_), lambda i, j: (i, j)),
        compiler_params=pltpu.CompilerParams(
            dimension_semantics=("parallel", "parallel"),
            vmem_limit_bytes=VMEM_LIMIT),
    )(x2d, w, b)
    return out[:n]


def pallas_flash_attention(q, k, v, bias, *, n_heads, d_k, heads_fused,
                           q_off=0, k_off=0, v_off=0, causal=False, tq=256, tk=256):
    """Flash attention.

    heads_fused=True : q/k/v are (B, L, n_blocks*d_k) bf16; the head split is done by the
                       index_maps (q_off/k_off/v_off are head-block offsets along the last
                       axis), and the output is a lane-dense (B, Lq, n_heads*d_k) bf16.
    heads_fused=False: q/k/v are (B*n_heads, L, d_k); output is (B*n_heads, Lq, d_k).

    bias  : (B, Lq, Lk) additive bf16 bias (0 keep / -1e9 drop), or None (no mask DMA).
    causal: block-skip hint; only valid when the supplied bias is actually causal.
    """
    if heads_fused:
        B, Lq, _ = q.shape
        Lk = k.shape[1]
        BH = B * n_heads
        qmap = lambda bh, qi, ki: (bh // n_heads, qi, q_off + bh % n_heads)
        kmap = lambda bh, qi, ki: (bh // n_heads, ki, k_off + bh % n_heads)
        vmap = lambda bh, qi, ki: (bh // n_heads, ki, v_off + bh % n_heads)
        omap = lambda bh, qi, ki: (bh // n_heads, qi, bh % n_heads)
        out_shape = jax.ShapeDtypeStruct((B, Lq, n_heads * d_k), jnp.bfloat16)
    else:
        BH, Lq, _ = q.shape
        Lk = k.shape[1]
        qmap = lambda bh, qi, ki: (bh, qi, 0)
        kmap = lambda bh, qi, ki: (bh, ki, 0)
        vmap = lambda bh, qi, ki: (bh, ki, 0)
        omap = lambda bh, qi, ki: (bh, qi, 0)
        out_shape = jax.ShapeDtypeStruct((BH, Lq, d_k), jnp.bfloat16)

    tq = min(tq, Lq)
    tk = min(tk, Lk)
    assert Lq % tq == 0 and Lk % tk == 0, "sequence lengths must divide tile sizes"

    use_mask = bias is not None
    kernel = functools.partial(_flash_attn_kernel, use_mask=use_mask,
                               causal=causal, tq=tq, tk=tk)

    in_specs = [pl.BlockSpec((1, tq, d_k), qmap),
                pl.BlockSpec((1, tk, d_k), kmap),
                pl.BlockSpec((1, tk, d_k), vmap)]
    operands = [q.astype(jnp.bfloat16), k.astype(jnp.bfloat16), v.astype(jnp.bfloat16)]
    if use_mask:
        in_specs.append(pl.BlockSpec((1, tq, tk),
                                     lambda bh, qi, ki: (bh // n_heads, qi, ki)))
        operands.append(bias)

    return pl.pallas_call(
        kernel,
        out_shape=out_shape,
        grid=(BH, Lq // tq, Lk // tk),
        in_specs=in_specs,
        out_specs=pl.BlockSpec((1, tq, d_k), omap),
        scratch_shapes=[pltpu.VMEM((tq, 1), jnp.float32),    # running max m
                        pltpu.VMEM((tq, 1), jnp.float32),    # running denom l
                        pltpu.VMEM((tq, d_k), jnp.float32)],  # running accumulator
        compiler_params=pltpu.CompilerParams(
            dimension_semantics=("parallel", "parallel", "arbitrary"),
            vmem_limit_bytes=VMEM_LIMIT),
    )(*operands)


# ----------------------------------------------------------------------------
# Module: parameters + forward
# ----------------------------------------------------------------------------
def init_params(seed, d_model, h):
    assert d_model % h == 0
    ks = jax.random.split(jax.random.PRNGKey(seed), 8)

    def lin(kw, kb, din, dout):
        bound = 1.0 / math.sqrt(din)
        w = jax.random.uniform(kw, (din, dout), jnp.float32, -bound, bound)
        b = jax.random.uniform(kb, (dout,), jnp.float32, -bound, bound)
        return w, b

    wq, bq = lin(ks[0], ks[1], d_model, d_model)
    wk, bk = lin(ks[2], ks[3], d_model, d_model)
    wv, bv = lin(ks[4], ks[5], d_model, d_model)
    wo, bo = lin(ks[6], ks[7], d_model, d_model)
    return dict(h=h, d_model=d_model,
                wq=wq, bq=bq, wk=wk, bk=bk, wv=wv, bv=bv, wo=wo, bo=bo)


def mha_forward(params, query, key, value, mask=None, key_padding_mask=None, causal=False):
    """Mirrors MultiHeadedAttention.forward with mod='' (default path).

    `causal=True` is an optional perf hint (skips above-diagonal K tiles); the supplied
    mask must itself be causal for it to be valid.
    """
    # TODO(synk): key_padding_mask is accepted but unused — the PyTorch default path
    # (mod='') only forwards it to attention() in the 'half' branch.
    # TODO(synk): 'half' / 'learned' / 'none' / 'fixed' mod branches are not implemented.
    del key_padding_mask
    B, Lq, D = query.shape
    Lk = key.shape[1]
    h = params['h']
    d_k = D // h
    scale = 1.0 / math.sqrt(d_k)          # folded into the Q projection weights below

    self_attn = (key is query) and (value is query)
    heads_fused = (d_k % 128 == 0)        # (8,128) rule: head slices must be lane-aligned

    # ---- mask -> additive bf16 bias (or nothing at all) ----
    if mask is None:
        bias = None
    else:
        m = mask.astype(jnp.float32)
        if m.ndim == 2:
            m = m[None]
        # masked_fill(mask==0, -1e9) realized as score + (mask-1)*1e9.
        # (Fully-masked rows give softmax over raw scores instead of uniform; identical
        #  whenever at least one key per row is unmasked, e.g. causal masks.)
        bias = ((jnp.broadcast_to(m, (B, Lq, Lk)) - 1.0) * 1e9).astype(jnp.bfloat16)

    # ---- projections (fused QKV matmul for self-attention), bf16 activations ----
    if self_attn:
        w_qkv = jnp.concatenate([params['wq'] * scale, params['wk'], params['wv']], axis=1)
        b_qkv = jnp.concatenate([params['bq'] * scale, params['bk'], params['bv']])
        qkv = pallas_linear(query.reshape(B * Lq, D), w_qkv, b_qkv)      # (B*Lq, 3D) bf16
        if heads_fused:
            qkv3 = qkv.reshape(B, Lq, 3 * D)
            x = pallas_flash_attention(qkv3, qkv3, qkv3, bias,
                                       n_heads=h, d_k=d_k, heads_fused=True,
                                       q_off=0, k_off=h, v_off=2 * h,
                                       causal=causal)                    # (B, Lq, D) bf16
            x2d = x.reshape(B * Lq, D)
        else:
            q2, k2, v2 = qkv[:, :D], qkv[:, D:2 * D], qkv[:, 2 * D:]
    else:
        q2 = pallas_linear(query.reshape(B * Lq, D), params['wq'] * scale,
                           params['bq'] * scale)
        k2 = pallas_linear(key.reshape(B * Lk, D), params['wk'], params['bk'])
        v2 = pallas_linear(value.reshape(B * Lk, D), params['wv'], params['bv'])
        if heads_fused:
            x = pallas_flash_attention(q2.reshape(B, Lq, D), k2.reshape(B, Lk, D),
                                       v2.reshape(B, Lk, D), bias,
                                       n_heads=h, d_k=d_k, heads_fused=True,
                                       causal=causal)                    # (B, Lq, D) bf16
            x2d = x.reshape(B * Lq, D)

    if not heads_fused:
        # head split/merge done in XLA, but carried in bf16 (half the HBM traffic)
        def split_heads(y2d, L):
            return jnp.transpose(y2d.reshape(B, L, h, d_k), (0, 2, 1, 3)).reshape(B * h, L, d_k)

        q = split_heads(q2, Lq)
        k = split_heads(k2, Lk)
        v = split_heads(v2, Lk)
        x = pallas_flash_attention(q, k, v, bias, n_heads=h, d_k=d_k,
                                   heads_fused=False, causal=causal)     # (B*h, Lq, d_k)
        x2d = jnp.transpose(x.reshape(B, h, Lq, d_k), (0, 2, 1, 3)).reshape(B * Lq, D)

    # ---- output projection (final result in f32) ----
    out = pallas_linear(x2d, params['wo'], params['bo'], out_dtype=jnp.float32)
    return out.reshape(B, Lq, D)


# ----------------------------------------------------------------------------
# Pure-JAX f32 reference (mirrors the PyTorch forward) for verification
# ----------------------------------------------------------------------------
def reference_forward(params, query, key, value, mask=None):
    B, Lq, D = query.shape
    Lk = key.shape[1]
    h = params['h']
    d_k = D // h

    def proj(x, w, b, L):
        y = x.reshape(B * L, D) @ w + b
        return jnp.transpose(y.reshape(B, L, h, d_k), (0, 2, 1, 3))

    q = proj(query, params['wq'], params['bq'], Lq)
    k = proj(key, params['wk'], params['bk'], Lk)
    v = proj(value, params['wv'], params['bv'], Lk)

    scores = jnp.einsum('bhqd,bhkd->bhqk', q, k) / math.sqrt(d_k)
    if mask is not None:
        m = mask if mask.ndim == 3 else mask[None]
        scores = jnp.where(m[:, None, :, :] == 0, -1000000000.0, scores)
    p = jax.nn.softmax(scores, axis=-1)
    x = jnp.einsum('bhqk,bhkd->bhqd', p, v)
    x = jnp.transpose(x, (0, 2, 1, 3)).reshape(B * Lq, D)
    return (x @ params['wo'] + params['bo']).reshape(B, Lq, D)


# ----------------------------------------------------------------------------
if __name__ == "__main__":
    ks = jax.random.split(jax.random.PRNGKey(0), 6)

    # --- 1) self-attention, causal mask, split-head path (d_k=16), multiple K tiles ---
    B, L, D, H = 2, 256, 64, 4
    params = init_params(0, D, H)
    x_self = jax.random.normal(ks[0], (B, L, D), jnp.float32)
    causal_mask = (jnp.arange(L)[None, :] <= jnp.arange(L)[:, None]).astype(jnp.float32)

    out = jax.block_until_ready(
        mha_forward(params, x_self, x_self, x_self, mask=causal_mask, causal=True))
    ref = reference_forward(params, x_self, x_self, x_self, mask=causal_mask)
    assert out.shape == (B, L, D)
    assert bool(jnp.all(jnp.isfinite(out)))
    err = float(jnp.max(jnp.abs(out - ref)))
    assert bool(jnp.allclose(out, ref, atol=3e-2, rtol=3e-2)), f"max abs diff {err}"

    # --- 2) cross-attention, different key length, no mask (mask-free kernel variant) ---
    Lq2, Lk2 = 16, 32
    q_in = jax.random.normal(ks[1], (B, Lq2, D), jnp.float32)
    kv_in = jax.random.normal(ks[2], (B, Lk2, D), jnp.float32)

    out2 = jax.block_until_ready(mha_forward(params, q_in, kv_in, kv_in, mask=None))
    ref2 = reference_forward(params, q_in, kv_in, kv_in, mask=None)
    assert out2.shape == (B, Lq2, D)
    assert bool(jnp.all(jnp.isfinite(out2)))
    err2 = float(jnp.max(jnp.abs(out2 - ref2)))
    assert bool(jnp.allclose(out2, ref2, atol=3e-2, rtol=3e-2)), f"max abs diff {err2}"

    # --- 3) wide model (d_k=128): fused-head I/O path (no XLA head transposes), causal ---
    B3, L3, D3, H3 = 2, 16, 512, 4
    params3 = init_params(1, D3, H3)
    x3 = jax.random.normal(ks[3], (B3, L3, D3), jnp.float32)
    causal3 = (jnp.arange(L3)[None, :] <= jnp.arange(L3)[:, None]).astype(jnp.float32)

    out3 = jax.block_until_ready(
        mha_forward(params3, x3, x3, x3, mask=causal3, causal=True))
    ref3 = reference_forward(params3, x3, x3, x3, mask=causal3)
    assert out3.shape == (B3, L3, D3)
    assert bool(jnp.all(jnp.isfinite(out3)))
    err3 = float(jnp.max(jnp.abs(out3 - ref3)))
    # bf16 MXU inputs / bf16 intermediates vs pure-f32 reference -> relaxed tolerance
    assert bool(jnp.allclose(out3, ref3, atol=5e-2, rtol=5e-2)), f"max abs diff {err3}"

    print("KERNEL_OK")
</pallas_src>

<mosaic_0001>
module attributes {stable_mosaic.version = 11 : i64} {
  func.func @_linear_kernel(%arg0: i32, %arg1: i32, %arg2: memref<512x64xbf16, #tpu.memory_space<vmem>>, %arg3: memref<64x192xbf16, #tpu.memory_space<vmem>>, %arg4: memref<1x192xf32, #tpu.memory_space<vmem>>, %arg5: memref<512x192xbf16, #tpu.memory_space<vmem>>) attributes {dimension_semantics = [#tpu.dimension_semantics<parallel>, #tpu.dimension_semantics<parallel>], iteration_bounds = array<i64: 1, 1>, scalar_prefetch = 0 : i64, scratch_operands = 0 : i64, tpu.core_type = #tpu.core_type<tc>, window_params = [{transform_indices = @transform_0, window_bounds = array<i64: 512, 64>}, {transform_indices = @transform_1, window_bounds = array<i64: 64, 192>}, {transform_indices = @transform_2, window_bounds = array<i64: 1, 192>}, {transform_indices = @transform_3, window_bounds = array<i64: 512, 192>}]} {
    %c0 = arith.constant 0 : index
    %c0_0 = arith.constant 0 : index
    %0 = vector.load %arg2[%c0, %c0_0] : memref<512x64xbf16, #tpu.memory_space<vmem>>, vector<512x64xbf16>
    %c0_1 = arith.constant 0 : index
    %c0_2 = arith.constant 0 : index
    %1 = vector.load %arg3[%c0_1, %c0_2] : memref<64x192xbf16, #tpu.memory_space<vmem>>, vector<64x192xbf16>
    %cst = arith.constant dense<0.000000e+00> : vector<512x192xf32>
    %2 = tpu.matmul %0, %1, %cst {dimension_numbers = #tpu.dot_dimension_numbers<[1], [0], [0], [1], [0, 0, 1, 1], [], []>} : vector<512x64xbf16>, vector<64x192xbf16>, vector<512x192xf32> -> vector<512x192xf32>
    %c0_3 = arith.constant 0 : index
    %c0_4 = arith.constant 0 : index
    %3 = vector.load %arg4[%c0_3, %c0_4] : memref<1x192xf32, #tpu.memory_space<vmem>>, vector<1x192xf32>
    %4 = vector.broadcast %3 : vector<1x192xf32> to vector<512x192xf32>
    %5 = arith.addf %2, %4 : vector<512x192xf32>
    %6 = arith.truncf %5 : vector<512x192xf32> to vector<512x192xbf16>
    %c0_5 = arith.constant 0 : index
    %c0_6 = arith.constant 0 : index
    %7 = vector.load %arg5[%c0_5, %c0_6] : memref<512x192xbf16, #tpu.memory_space<vmem>>, vector<512x192xbf16>
    tpu.vector_store %arg5[%c0_5, %c0_6], %6 {strides = array<i32>} : memref<512x192xbf16, #tpu.memory_space<vmem>>, vector<512x192xbf16>,
    return
  }
  func.func @transform_0(%arg0: i32, %arg1: i32) -> (i32, i32) {
    %c0_i32 = arith.constant 0 : i32
    %c0_i32_0 = arith.constant 0 : i32
    return %arg0, %c0_i32 : i32, i32
  }
  func.func @transform_1(%arg0: i32, %arg1: i32) -> (i32, i32) {
    %c0_i32 = arith.constant 0 : i32
    %c0_i32_0 = arith.constant 0 : i32
    return %c0_i32, %arg1 : i32, i32
  }
  func.func @transform_2(%arg0: i32, %arg1: i32) -> (i32, i32) {
    %c0_i32 = arith.constant 0 : i32
    %c0_i32_0 = arith.constant 0 : i32
    return %c0_i32, %arg1 : i32, i32
  }
  func.func @transform_3(%arg0: i32, %arg1: i32) -> (i32, i32) {
    %c0_i32 = arith.constant 0 : i32
    return %arg0, %arg1 : i32, i32
  }
}

</mosaic_0001>

<bundles_post_ra>
// kernel: tpu_custom_call.1
= control target key start
LH: loop header
LB: loop body
LE: loop exit
PB: predicated region body
PF: predicated region fallthrough
CT: control target
= control target key end

     0   :  { %v1457_v1 = vmov 0   ;;  %vm299_vm0 = vcmask 523264   ;;  %v89_v41 = vlaneseq  ;;  %vm1133_vm1 = vcmask 1043456   ;;  %s2121_s1 = inlined_call_operand.vmem [shape: bf16[64,192], index: 1, kind: input, shape index: {}]   ;;  %s2122_s0 = inlined_call_operand.vmem [shape: bf16[512,64], index: 0, kind: input, shape index: {}]   ;;  %s2123_s2 = inlined_call_operand.vmem [shape: f32[1,192], index: 2, kind: input, shape index: {}]   ;;  %s2124_s3 = inlined_call_operand.vmem [shape: bf16[512,192], index: 3, kind: output, shape index: {}]  }
   0x1   :  { %v1413_v0 = vld [vmem:[%s2121_s1 + $0x4] ss:$8 sps:$4 sm:$0xff]   ;;  %428 = vmatprep.mubr.bf16.mxu0 %v1457_v1  ;;  %588 = vmatprep.mubr.bf16.mxu1 %v1457_v1  ;;  %v1415_v2 = vld [vmem:[%s2121_s1] ss:$8 sps:$4 sm:$0xff]   ;;  %v1416_v3 = vld [vmem:[%s2121_s1 + $0x14] ss:$8 sps:$4 sm:$0xff]  }
   0x2   :  { %396 = vmatprep.subr.bf16.mxu0 %v1413_v0  ;;  %1404 = vmatprep.subr.bf16.mxu1 %v1413_v0  ;;  %v1418_v4 = vld [vmem:[%s2121_s1 + $0x10] ss:$8 sps:$4 sm:$0xff]   ;;  %v1419_v5 = vld [vmem:[%s2121_s1 + $0x24] ss:$8 sps:$4 sm:$0xff]   ;;  %v1421_v6 = vld [vmem:[%s2121_s1 + $0x20] ss:$8 sps:$4 sm:$0xff]  }
   0x3   :  { %397 = vmatpush1.bf16.msra.mxu0 %v1415_v2  ;;  %1408 = vmatpush1.bf16.msra.mxu1 %v1415_v2  ;;  %v1422_v7 = vld [vmem:[%s2121_s1 + $0x34] ss:$8 sps:$4 sm:$0xff]   ;;  %v1424_v8 = vld [vmem:[%s2121_s1 + $0x30] ss:$8 sps:$4 sm:$0xff]   ;;  %v1425_v9 = vld [vmem:[%s2122_s0] sm:$0xff]   ;;  %v90_v42 = vshrl.u32 %v89_v41, 7 }
   0x4   :  { %398 = vmatprep.subr.bf16.mxu0 %v1416_v3  ;;  %1405 = vmatprep.subr.bf16.mxu1 %v1416_v3  ;;  %v1426_v10 = vld [vmem:[%s2122_s0 + $0x80] sm:$0xff]   ;;  %v1427_v11 = vld [vmem:[%s2122_s0 + $0x8] sm:$0xff]   ;;  %v1429_v13 = vld [vmem:[%s2122_s0 + $0x10] sm:$0xff]   ;;  %vm1134_vm2 = vcmask 523268  }
   0x5   :  { %v1428_v12 = vld [vmem:[%s2122_s0 + $0x88] sm:$0xff]   ;;  %v1430_v14 = vld [vmem:[%s2122_s0 + $0x90] sm:$0xff]   ;;  %v1431_v15 = vld [vmem:[%s2122_s0 + $0x18] sm:$0xff]   ;;  %v91_v43 = vsub.s32 0, %v90_v42  ;;  %v95_v45 = vsub.s32 1, %v90_v42 }
   0x6   :  { %v1432_v16 = vld [vmem:[%s2122_s0 + $0x98] sm:$0xff]   ;;  %v1433_v17 = vld [vmem:[%s2122_s0 + $0x20] sm:$0xff]   ;;  %v1435_v19 = vld [vmem:[%s2122_s0 + $0x28] sm:$0xff]  }
   0x7   :  { %399 = vmatpush1.bf16.msra.mxu0 %v1418_v4  ;;  %1409 = vmatpush1.bf16.msra.mxu1 %v1418_v4  ;;  %v1434_v18 = vld [vmem:[%s2122_s0 + $0xa0] sm:$0xff]   ;;  %v1436_v20 = vld [vmem:[%s2122_s0 + $0xa8] sm:$0xff]   ;;  %v1437_v21 = vld [vmem:[%s2122_s0 + $0x30] sm:$0xff]  }
   0x8   :  { %400 = vmatprep.subr.bf16.mxu0 %v1419_v5  ;;  %1406 = vmatprep.subr.bf16.mxu1 %v1419_v5  ;;  %v1438_v22 = vld [vmem:[%s2122_s0 + $0xb0] sm:$0xff]   ;;  %v1439_v23 = vld [vmem:[%s2122_s0 + $0x38] sm:$0xff]   ;;  %v1441_v25 = vld [vmem:[%s2122_s0 + $0x40] sm:$0xff]  }
   0x9   :  { %v1440_v24 = vld [vmem:[%s2122_s0 + $0xb8] sm:$0xff]   ;;  %v1442_v26 = vld [vmem:[%s2122_s0 + $0xc0] sm:$0xff]   ;;  %v1443_v27 = vld [vmem:[%s2122_s0 + $0x48] sm:$0xff]  }
   0xa   :  { %v1444_v28 = vld [vmem:[%s2122_s0 + $0xc8] sm:$0xff]   ;;  %v1445_v29 = vld [vmem:[%s2122_s0 + $0x50] sm:$0xff]   ;;  %v1447_v31 = vld [vmem:[%s2122_s0 + $0x58] sm:$0xff]  }
   0xb   :  { %401 = vmatpush1.bf16.msra.mxu0 %v1421_v6  ;;  %1410 = vmatpush1.bf16.msra.mxu1 %v1421_v6  ;;  %v1446_v30 = vld [vmem:[%s2122_s0 + $0xd0] sm:$0xff]   ;;  %v1448_v32 = vld [vmem:[%s2122_s0 + $0xd8] sm:$0xff]   ;;  %v1449_v33 = vld [vmem:[%s2122_s0 + $0x60] sm:$0xff]  }
   0xc   :  { %402 = vmatprep.subr.bf16.mxu0 %v1422_v7  ;;  %1407 = vmatprep.subr.bf16.mxu1 %v1422_v7  ;;  %v1450_v34 = vld [vmem:[%s2122_s0 + $0xe0] sm:$0xff]   ;;  %v1451_v35 = vld [vmem:[%s2122_s0 + $0x68] sm:$0xff]   ;;  %v1453_v37 = vld [vmem:[%s2122_s0 + $0x70] sm:$0xff]  }
   0xd   :  { %v1452_v36 = vld [vmem:[%s2122_s0 + $0xe8] sm:$0xff]   ;;  %v1454_v38 = vld [vmem:[%s2122_s0 + $0xf0] sm:$0xff]   ;;  %v1455_v39 = vld [vmem:[%s2122_s0 + $0x78] sm:$0xff]  }
   0xe   :  { %v1456_v40 = vld [vmem:[%s2122_s0 + $0xf8] sm:$0xff]   ;;  %v87_v44 = vld [vmem:[%s2123_s2] sm:$0x3]  ;;  %vm1673_vm3 = vmor %vm1134_vm2, %vm1133_vm1 }
   0xf   :  { %403 = vmatpush1.bf16.msra.mxu0 %v1424_v8  ;;  %1411 = vmatpush1.bf16.msra.mxu1 %v1424_v8  ;;  %v1665_v46 = vrot.slane %v87_v44, %v91_v43  ;;  %v1667_v47 = vrot.slane %v87_v44, %v95_v45 }
  0x12   :  { %1244 = vmatmul.mubr.msk.bf16.vlgmr.msra.gmra.mrb[0].mxu0 %vm299_vm0, %v1425_v9  ;;  %1260 = vmatmul.mubr.msk.bf16.vlgmr.msra.gmra.mrb[0].mxu1 %vm299_vm0, %v1426_v10 }
  0x13   :  { %438 = vmatprep.mubr.bf16.mxu0 %v1457_v1  ;;  %598 = vmatprep.mubr.bf16.mxu1 %v1457_v1 }
  0x1a   :  { %1245 = vmatmul.mubr.msk.bf16.gmra.mrb[4].mxu0 %vm299_vm0, %v1427_v11  ;;  %1261 = vmatmul.mubr.msk.bf16.gmra.mrb[4].mxu1 %vm299_vm0, %v1428_v12 }
  0x1b   :  { %448 = vmatprep.mubr.bf16.mxu0 %v1457_v1  ;;  %608 = vmatprep.mubr.bf16.mxu1 %v1457_v1 }
  0x22   :  { %1246 = vmatmul.mubr.msk.bf16.gmra.mrb[8].mxu0 %vm299_vm0, %v1429_v13  ;;  %1262 = vmatmul.mubr.msk.bf16.gmra.mrb[8].mxu1 %vm299_vm0, %v1430_v14 }
  0x23   :  { %458 = vmatprep.mubr.bf16.mxu0 %v1457_v1  ;;  %618 = vmatprep.mubr.bf16.mxu1 %v1457_v1 }
  0x2a   :  { %1247 = vmatmul.mubr.msk.bf16.gmra.mrb[12].mxu0 %vm299_vm0, %v1431_v15  ;;  %1263 = vmatmul.mubr.msk.bf16.gmra.mrb[12].mxu1 %vm299_vm0, %v1432_v16 }
  0x2b   :  { %468 = vmatprep.mubr.bf16.mxu0 %v1457_v1  ;;  %628 = vmatprep.mubr.bf16.mxu1 %v1457_v1 }
  0x32   :  { %1248 = vmatmul.mubr.msk.bf16.gmra.mrb[16].mxu0 %vm299_vm0, %v1433_v17  ;;  %1264 = vmatmul.mubr.msk.bf16.gmra.mrb[16].mxu1 %vm299_vm0, %v1434_v18 }
  0x33   :  { %478 = vmatprep.mubr.bf16.mxu0 %v1457_v1  ;;  %638 = vmatprep.mubr.bf16.mxu1 %v1457_v1 }
  0x3a   :  { %1249 = vmatmul.mubr.msk.bf16.gmra.mrb[20].mxu0 %vm299_vm0, %v1435_v19  ;;  %1265 = vmatmul.mubr.msk.bf16.gmra.mrb[20].mxu1 %vm299_vm0, %v1436_v20 }
  0x3b   :  { %488 = vmatprep.mubr.bf16.mxu0 %v1457_v1  ;;  %648 = vmatprep.mubr.bf16.mxu1 %v1457_v1 }
  0x42   :  { %1250 = vmatmul.mubr.msk.bf16.gmra.mrb[24].mxu0 %vm299_vm0, %v1437_v21  ;;  %1266 = vmatmul.mubr.msk.bf16.gmra.mrb[24].mxu1 %vm299_vm0, %v1438_v22 }
  0x43   :  { %498 = vmatprep.mubr.bf16.mxu0 %v1457_v1  ;;  %658 = vmatprep.mubr.bf16.mxu1 %v1457_v1 }
  0x4a   :  { %1251 = vmatmul.mubr.msk.bf16.gmra.mrb[28].mxu0 %vm299_vm0, %v1439_v23  ;;  %1267 = vmatmul.mubr.msk.bf16.gmra.mrb[28].mxu1 %vm299_vm0, %v1440_v24 }
  0x4b   :  { %508 = vmatprep.mubr.bf16.mxu0 %v1457_v1  ;;  %668 = vmatprep.mubr.bf16.mxu1 %v1457_v1 }
  0x52   :  { %1252 = vmatmul.mubr.msk.bf16.gmra.mrb[32].mxu0 %vm299_vm0, %v1441_v25  ;;  %1268 = vmatmul.mubr.msk.bf16.gmra.mrb[32].mxu1 %vm299_vm0, %v1442_v26 }
  0x53   :  { %518 = vmatprep.mubr.bf16.mxu0 %v1457_v1  ;;  %678 = vmatprep.mubr.bf16.mxu1 %v1457_v1 }
  0x5a   :  { %1253 = vmatmul.mubr.msk.bf16.gmra.mrb[36].mxu0 %vm299_vm0, %v1443_v27  ;;  %1269 = vmatmul.mubr.msk.bf16.gmra.mrb[36].mxu1 %vm299_vm0, %v1444_v28 }
  0x5b   :  { %528 = vmatprep.mubr.bf16.mxu0 %v1457_v1  ;;  %688 = vmatprep.mubr.bf16.mxu1 %v1457_v1 }
  0x62   :  { %1254 = vmatmul.mubr.msk.bf16.gmra.mrb[40].mxu0 %vm299_vm0, %v1445_v29  ;;  %1270 = vmatmul.mubr.msk.bf16.gmra.mrb[40].mxu1 %vm299_vm0, %v1446_v30 }
  0x63   :  { %538 = vmatprep.mubr.bf16.mxu0 %v1457_v1  ;;  %698 = vmatprep.mubr.bf16.mxu1 %v1457_v1 }
  0x6a   :  { %1255 = vmatmul.mubr.msk.bf16.gmra.mrb[44].mxu0 %vm299_vm0, %v1447_v31  ;;  %1271 = vmatmul.mubr.msk.bf16.gmra.mrb[44].mxu1 %vm299_vm0, %v1448_v32 }
  0x6b   :  { %548 = vmatprep.mubr.bf16.mxu0 %v1457_v1  ;;  %708 = vmatprep.mubr.bf16.mxu1 %v1457_v1 }
  0x72   :  { %1256 = vmatmul.mubr.msk.bf16.gmra.mrb[48].mxu0 %vm299_vm0, %v1449_v33  ;;  %1272 = vmatmul.mubr.msk.bf16.gmra.mrb[48].mxu1 %vm299_vm0, %v1450_v34 }
  0x73   :  { %558 = vmatprep.mubr.bf16.mxu0 %v1457_v1  ;;  %718 = vmatprep.mubr.bf16.mxu1 %v1457_v1 }
  0x7a   :  { %1257 = vmatmul.mubr.msk.bf16.gmra.mrb[52].mxu0 %vm299_vm0, %v1451_v35  ;;  %1273 = vmatmul.mubr.msk.bf16.gmra.mrb[52].mxu1 %vm299_vm0, %v1452_v36 }
  0x7b   :  { %568 = vmatprep.mubr.bf16.mxu0 %v1457_v1  ;;  %728 = vmatprep.mubr.bf16.mxu1 %v1457_v1 }
  0x82   :  { %1258 = vmatmul.mubr.msk.bf16.gmra.mrb[56].mxu0 %vm299_vm0, %v1453_v37  ;;  %1274 = vmatmul.mubr.msk.bf16.gmra.mrb[56].mxu1 %vm299_vm0, %v1454_v38 }
  0x83   :  { %578 = vmatprep.mubr.bf16.mxu0 %v1457_v1  ;;  %738 = vmatprep.mubr.bf16.mxu1 %v1457_v1 }
  0x8a   :  { %1259 = vmatmul.mubr.msk.bf16.gmra.mrb[60].mxu0 %vm299_vm0, %v1455_v39  ;;  %1275 = vmatmul.mubr.msk.bf16.gmra.mrb[60].mxu1 %vm299_vm0, %v1456_v40 }
  0xe5   :  { %v430_v48 = vpop.f32.mrb[0].mxu0  ;;  %v590_v49 = vpop.f32.mrb[0].mxu1 }
  0xe6   :  { %v431_v50 = vadd.f32 %v430_v48, %v1665_v46  ;;  %v591_v51 = vadd.f32 %v590_v49, %v1665_v46  ;;  %v432_v52 = vpop.f32.mrb[1].mxu0  ;;  %v592_v53 = vpop.f32.mrb[1].mxu1 }
  0xe7   :  { %v433_v54 = vadd.f32 %v432_v52, %v1667_v47  ;;  %v593_v55 = vadd.f32 %v592_v53, %v1667_v47  ;;  %v434_v56 = vpop.f32.mrb[2].mxu0  ;;  %v594_v57 = vpop.f32.mrb[2].mxu1 }
  0xe8   :  { %v435_v59 = vadd.f32 %v434_v56, %v1665_v46  ;;  %v595_v60 = vadd.f32 %v594_v57, %v1665_v46  ;;  %v436_v61 = vpop.f32.mrb[3].mxu0  ;;  %v596_v62 = vpop.f32.mrb[3].mxu1 }
  0xe9   :  { %v1340_v63 = vpack.c.bf16 %v433_v54, %v431_v50  ;;  %v1372_v0 = vpack.c.bf16 %v593_v55, %v591_v51  ;;  %v437_v1 = vadd.f32 %v436_v61, %v1667_v47  ;;  %v597_v2 = vadd.f32 %v596_v62, %v1667_v47 }
  0xeb   :  { %1136 = vst.msk [vmem:[%s2124_s3] sm:$0xff] %vm1673_vm3, %v1340_v63  ;;  %1168 = vst.msk [vmem:[%s2124_s3 + $0x100] sm:$0xff] %vm1673_vm3, %v1372_v0  ;;  %v1341_v3 = vpack.c.bf16 %v437_v1, %v435_v59  ;;  %v1373_v4 = vpack.c.bf16 %v597_v2, %v595_v60 }
  0xed   :  { %1137 = vst.msk [vmem:[%s2124_s3 + $0x8] sm:$0xff] %vm1673_vm3, %v1341_v3  ;;  %1169 = vst.msk [vmem:[%s2124_s3 + $0x108] sm:$0xff] %vm1673_vm3, %v1373_v4  ;;  %v440_v5 = vpop.f32.mrb[4].mxu0  ;;  %v600_v6 = vpop.f32.mrb[4].mxu1 }
  0xee   :  { %v441_v7 = vadd.f32 %v440_v5, %v1665_v46  ;;  %v601_v8 = vadd.f32 %v600_v6, %v1665_v46  ;;  %v442_v9 = vpop.f32.mrb[5].mxu0  ;;  %v602_v10 = vpop.f32.mrb[5].mxu1 }
  0xef   :  { %v443_v11 = vadd.f32 %v442_v9, %v1667_v47  ;;  %v603_v12 = vadd.f32 %v602_v10, %v1667_v47  ;;  %v444_v13 = vpop.f32.mrb[6].mxu0  ;;  %v604_v14 = vpop.f32.mrb[6].mxu1 }
  0xf0   :  { %v445_v15 = vadd.f32 %v444_v13, %v1665_v46  ;;  %v605_v16 = vadd.f32 %v604_v14, %v1665_v46  ;;  %v446_v17 = vpop.f32.mrb[7].mxu0  ;;  %v606_v18 = vpop.f32.mrb[7].mxu1 }
  0xf1   :  { %v1342_v19 = vpack.c.bf16 %v443_v11, %v441_v7  ;;  %v1374_v20 = vpack.c.bf16 %v603_v12, %v601_v8  ;;  %v447_v21 = vadd.f32 %v446_v17, %v1667_v47  ;;  %v607_v22 = vadd.f32 %v606_v18, %v1667_v47 }
  0xf3   :  { %1138 = vst.msk [vmem:[%s2124_s3 + $0x10] sm:$0xff] %vm1673_vm3, %v1342_v19  ;;  %1170 = vst.msk [vmem:[%s2124_s3 + $0x110] sm:$0xff] %vm1673_vm3, %v1374_v20  ;;  %v1343_v23 = vpack.c.bf16 %v447_v21, %v445_v15  ;;  %v1375_v24 = vpack.c.bf16 %v607_v22, %v605_v16 }
  0xf5   :  { %1139 = vst.msk [vmem:[%s2124_s3 + $0x18] sm:$0xff] %vm1673_vm3, %v1343_v23  ;;  %1171 = vst.msk [vmem:[%s2124_s3 + $0x118] sm:$0xff] %vm1673_vm3, %v1375_v24  ;;  %v450_v25 = vpop.f32.mrb[8].mxu0  ;;  %v610_v26 = vpop.f32.mrb[8].mxu1 }
  0xf6   :  { %v451_v27 = vadd.f32 %v450_v25, %v1665_v46  ;;  %v611_v28 = vadd.f32 %v610_v26, %v1665_v46  ;;  %v452_v29 = vpop.f32.mrb[9].mxu0  ;;  %v612_v30 = vpop.f32.mrb[9].mxu1 }
  0xf7   :  { %v453_v31 = vadd.f32 %v452_v29, %v1667_v47  ;;  %v613_v32 = vadd.f32 %v612_v30, %v1667_v47  ;;  %v454_v33 = vpop.f32.mrb[10].mxu0  ;;  %v614_v34 = vpop.f32.mrb[10].mxu1 }
  0xf8   :  { %v455_v35 = vadd.f32 %v454_v33, %v1665_v46  ;;  %v615_v36 = vadd.f32 %v614_v34, %v1665_v46  ;;  %v456_v37 = vpop.f32.mrb[11].mxu0  ;;  %v616_v38 = vpop.f32.mrb[11].mxu1 }
  0xf9   :  { %v1344_v39 = vpack.c.bf16 %v453_v31, %v451_v27  ;;  %v1376_v40 = vpack.c.bf16 %v613_v32, %v611_v28  ;;  %v457_v41 = vadd.f32 %v456_v37, %v1667_v47  ;;  %v617_v42 = vadd.f32 %v616_v38, %v1667_v47 }
  0xfb   :  { %1140 = vst.msk [vmem:[%s2124_s3 + $0x20] sm:$0xff] %vm1673_vm3, %v1344_v39  ;;  %1172 = vst.msk [vmem:[%s2124_s3 + $0x120] sm:$0xff] %vm1673_vm3, %v1376_v40  ;;  %v1345_v43 = vpack.c.bf16 %v457_v41, %v455_v35  ;;  %v1377_v44 = vpack.c.bf16 %v617_v42, %v615_v36 }
  0xfd   :  { %1141 = vst.msk [vmem:[%s2124_s3 + $0x28] sm:$0xff] %vm1673_vm3, %v1345_v43  ;;  %1173 = vst.msk [vmem:[%s2124_s3 + $0x128] sm:$0xff] %vm1673_vm3, %v1377_v44  ;;  %v460_v45 = vpop.f32.mrb[12].mxu0  ;;  %v620_v48 = vpop.f32.mrb[12].mxu1 }
  0xfe   :  { %v461_v49 = vadd.f32 %v460_v45, %v1665_v46  ;;  %v621_v50 = vadd.f32 %v620_v48, %v1665_v46  ;;  %v462_v51 = vpop.f32.mrb[13].mxu0  ;;  %v622_v52 = vpop.f32.mrb[13].mxu1 }
  0xff   :  { %v463_v53 = vadd.f32 %v462_v51, %v1667_v47  ;;  %v623_v54 = vadd.f32 %v622_v52, %v1667_v47  ;;  %v464_v55 = vpop.f32.mrb[14].mxu0  ;;  %v624_v56 = vpop.f32.mrb[14].mxu1 }
 0x100   :  { %v465_v57 = vadd.f32 %v464_v55, %v1665_v46  ;;  %v625_v59 = vadd.f32 %v624_v56, %v1665_v46  ;;  %v466_v60 = vpop.f32.mrb[15].mxu0  ;;  %v626_v61 = vpop.f32.mrb[15].mxu1 }
 0x101   :  { %v1346_v62 = vpack.c.bf16 %v463_v53, %v461_v49  ;;  %v1378_v63 = vpack.c.bf16 %v623_v54, %v621_v50  ;;  %v467_v0 = vadd.f32 %v466_v60, %v1667_v47  ;;  %v627_v1 = vadd.f32 %v626_v61, %v1667_v47 }
 0x103   :  { %1142 = vst.msk [vmem:[%s2124_s3 + $0x30] sm:$0xff] %vm1673_vm3, %v1346_v62  ;;  %1174 = vst.msk [vmem:[%s2124_s3 + $0x130] sm:$0xff] %vm1673_vm3, %v1378_v63  ;;  %v1347_v2 = vpack.c.bf16 %v467_v0, %v465_v57  ;;  %v1379_v3 = vpack.c.bf16 %v627_v1, %v625_v59 }
 0x105   :  { %1143 = vst.msk [vmem:[%s2124_s3 + $0x38] sm:$0xff] %vm1673_vm3, %v1347_v2  ;;  %1175 = vst.msk [vmem:[%s2124_s3 + $0x138] sm:$0xff] %vm1673_vm3, %v1379_v3  ;;  %v470_v4 = vpop.f32.mrb[16].mxu0  ;;  %v630_v5 = vpop.f32.mrb[16].mxu1 }
 0x106   :  { %v471_v6 = vadd.f32 %v470_v4, %v1665_v46  ;;  %v631_v7 = vadd.f32 %v630_v5, %v1665_v46  ;;  %v472_v8 = vpop.f32.mrb[17].mxu0  ;;  %v632_v9 = vpop.f32.mrb[17].mxu1 }
 0x107   :  { %v473_v10 = vadd.f32 %v472_v8, %v1667_v47  ;;  %v633_v11 = vadd.f32 %v632_v9, %v1667_v47  ;;  %v474_v12 = vpop.f32.mrb[18].mxu0  ;;  %v634_v13 = vpop.f32.mrb[18].mxu1 }
 0x108   :  { %v475_v14 = vadd.f32 %v474_v12, %v1665_v46  ;;  %v635_v15 = vadd.f32 %v634_v13, %v1665_v46  ;;  %v476_v16 = vpop.f32.mrb[19].mxu0  ;;  %v636_v17 = vpop.f32.mrb[19].mxu1 }
 0x109   :  { %v1348_v18 = vpack.c.bf16 %v473_v10, %v471_v6  ;;  %v1380_v19 = vpack.c.bf16 %v633_v11, %v631_v7  ;;  %v477_v20 = vadd.f32 %v476_v16, %v1667_v47  ;;  %v637_v21 = vadd.f32 %v636_v17, %v1667_v47 }
 0x10b   :  { %1144 = vst.msk [vmem:[%s2124_s3 + $0x40] sm:$0xff] %vm1673_vm3, %v1348_v18  ;;  %1176 = vst.msk [vmem:[%s2124_s3 + $0x140] sm:$0xff] %vm1673_vm3, %v1380_v19  ;;  %v1349_v22 = vpack.c.bf16 %v477_v20, %v475_v14  ;;  %v1381_v23 = vpack.c.bf16 %v637_v21, %v635_v15 }
 0x10d   :  { %1145 = vst.msk [vmem:[%s2124_s3 + $0x48] sm:$0xff] %vm1673_vm3, %v1349_v22  ;;  %1177 = vst.msk [vmem:[%s2124_s3 + $0x148] sm:$0xff] %vm1673_vm3, %v1381_v23  ;;  %v480_v24 = vpop.f32.mrb[20].mxu0  ;;  %v640_v25 = vpop.f32.mrb[20].mxu1 }
 0x10e   :  { %v481_v26 = vadd.f32 %v480_v24, %v1665_v46  ;;  %v641_v27 = vadd.f32 %v640_v25, %v1665_v46  ;;  %v482_v28 = vpop.f32.mrb[21].mxu0  ;;  %v642_v29 = vpop.f32.mrb[21].mxu1 }
 0x10f   :  { %v483_v30 = vadd.f32 %v482_v28, %v1667_v47  ;;  %v643_v31 = vadd.f32 %v642_v29, %v1667_v47  ;;  %v484_v32 = vpop.f32.mrb[22].mxu0  ;;  %v644_v33 = vpop.f32.mrb[22].mxu1 }
 0x110   :  { %v485_v34 = vadd.f32 %v484_v32, %v1665_v46  ;;  %v645_v35 = vadd.f32 %v644_v33, %v1665_v46  ;;  %v486_v36 = vpop.f32.mrb[23].mxu0  ;;  %v646_v37 = vpop.f32.mrb[23].mxu1 }
 0x111   :  { %v1350_v38 = vpack.c.bf16 %v483_v30, %v481_v26  ;;  %v1382_v39 = vpack.c.bf16 %v643_v31, %v641_v27  ;;  %v487_v40 = vadd.f32 %v486_v36, %v1667_v47  ;;  %v647_v41 = vadd.f32 %v646_v37, %v1667_v47 }
 0x113   :  { %1146 = vst.msk [vmem:[%s2124_s3 + $0x50] sm:$0xff] %vm1673_vm3, %v1350_v38  ;;  %1178 = vst.msk [vmem:[%s2124_s3 + $0x150] sm:$0xff] %vm1673_vm3, %v1382_v39  ;;  %v1351_v42 = vpack.c.bf16 %v487_v40, %v485_v34  ;;  %v1383_v43 = vpack.c.bf16 %v647_v41, %v645_v35 }
 0x115   :  { %1147 = vst.msk [vmem:[%s2124_s3 + $0x58] sm:$0xff] %vm1673_vm3, %v1351_v42  ;;  %1179 = vst.msk [vmem:[%s2124_s3 + $0x158] sm:$0xff] %vm1673_vm3, %v1383_v43  ;;  %v490_v44 = vpop.f32.mrb[24].mxu0  ;;  %v650_v45 = vpop.f32.mrb[24].mxu1 }
 0x116   :  { %v491_v48 = vadd.f32 %v490_v44, %v1665_v46  ;;  %v651_v49 = vadd.f32 %v650_v45, %v1665_v46  ;;  %v492_v50 = vpop.f32.mrb[25].mxu0  ;;  %v652_v51 = vpop.f32.mrb[25].mxu1 }
 0x117   :  { %v493_v52 = vadd.f32 %v492_v50, %v1667_v47  ;;  %v653_v53 = vadd.f32 %v652_v51, %v1667_v47  ;;  %v494_v54 = vpop.f32.mrb[26].mxu0  ;;  %v654_v55 = vpop.f32.mrb[26].mxu1 }
 0x118   :  { %v495_v56 = vadd.f32 %v494_v54, %v1665_v46  ;;  %v655_v57 = vadd.f32 %v654_v55, %v1665_v46  ;;  %v496_v59 = vpop.f32.mrb[27].mxu0  ;;  %v656_v60 = vpop.f32.mrb[27].mxu1 }
 0x119   :  { %v1352_v61 = vpack.c.bf16 %v493_v52, %v491_v48  ;;  %v1384_v62 = vpack.c.bf16 %v653_v53, %v651_v49  ;;  %v497_v63 = vadd.f32 %v496_v59, %v1667_v47  ;;  %v657_v0 = vadd.f32 %v656_v60, %v1667_v47 }
 0x11b   :  { %1148 = vst.msk [vmem:[%s2124_s3 + $0x60] sm:$0xff] %vm1673_vm3, %v1352_v61  ;;  %1180 = vst.msk [vmem:[%s2124_s3 + $0x160] sm:$0xff] %vm1673_vm3, %v1384_v62  ;;  %v1353_v1 = vpack.c.bf16 %v497_v63, %v495_v56  ;;  %v1385_v2 = vpack.c.bf16 %v657_v0, %v655_v57 }
 0x11d   :  { %1149 = vst.msk [vmem:[%s2124_s3 + $0x68] sm:$0xff] %vm1673_vm3, %v1353_v1  ;;  %1181 = vst.msk [vmem:[%s2124_s3 + $0x168] sm:$0xff] %vm1673_vm3, %v1385_v2  ;;  %v500_v3 = vpop.f32.mrb[28].mxu0  ;;  %v660_v4 = vpop.f32.mrb[28].mxu1 }
 0x11e   :  { %v501_v5 = vadd.f32 %v500_v3, %v1665_v46  ;;  %v661_v6 = vadd.f32 %v660_v4, %v1665_v46  ;;  %v502_v7 = vpop.f32.mrb[29].mxu0  ;;  %v662_v8 = vpop.f32.mrb[29].mxu1 }
 0x11f   :  { %v503_v9 = vadd.f32 %v502_v7, %v1667_v47  ;;  %v663_v10 = vadd.f32 %v662_v8, %v1667_v47  ;;  %v504_v11 = vpop.f32.mrb[30].mxu0  ;;  %v664_v12 = vpop.f32.mrb[30].mxu1 }
 0x120   :  { %v505_v13 = vadd.f32 %v504_v11, %v1665_v46  ;;  %v665_v14 = vadd.f32 %v664_v12, %v1665_v46  ;;  %v506_v15 = vpop.f32.mrb[31].mxu0  ;;  %v666_v16 = vpop.f32.mrb[31].mxu1 }
 0x121   :  { %v1354_v17 = vpack.c.bf16 %v503_v9, %v501_v5  ;;  %v1386_v18 = vpack.c.bf16 %v663_v10, %v661_v6  ;;  %v507_v19 = vadd.f32 %v506_v15, %v1667_v47  ;;  %v667_v20 = vadd.f32 %v666_v16, %v1667_v47 }
 0x123   :  { %1150 = vst.msk [vmem:[%s2124_s3 + $0x70] sm:$0xff] %vm1673_vm3, %v1354_v17  ;;  %1182 = vst.msk [vmem:[%s2124_s3 + $0x170] sm:$0xff] %vm1673_vm3, %v1386_v18  ;;  %v1355_v21 = vpack.c.bf16 %v507_v19, %v505_v13  ;;  %v1387_v22 = vpack.c.bf16 %v667_v20, %v665_v14 }
 0x125   :  { %1151 = vst.msk [vmem:[%s2124_s3 + $0x78] sm:$0xff] %vm1673_vm3, %v1355_v21  ;;  %1183 = vst.msk [vmem:[%s2124_s3 + $0x178] sm:$0xff] %vm1673_vm3, %v1387_v22  ;;  %v510_v23 = vpop.f32.mrb[32].mxu0  ;;  %v670_v24 = vpop.f32.mrb[32].mxu1 }
 0x126   :  { %v511_v25 = vadd.f32 %v510_v23, %v1665_v46  ;;  %v671_v26 = vadd.f32 %v670_v24, %v1665_v46  ;;  %v512_v27 = vpop.f32.mrb[33].mxu0  ;;  %v672_v28 = vpop.f32.mrb[33].mxu1 }
 0x127   :  { %v513_v29 = vadd.f32 %v512_v27, %v1667_v47  ;;  %v673_v30 = vadd.f32 %v672_v28, %v1667_v47  ;;  %v514_v31 = vpop.f32.mrb[34].mxu0  ;;  %v674_v32 = vpop.f32.mrb[34].mxu1 }
 0x128   :  { %v515_v33 = vadd.f32 %v514_v31, %v1665_v46  ;;  %v675_v34 = vadd.f32 %v674_v32, %v1665_v46  ;;  %v516_v35 = vpop.f32.mrb[35].mxu0  ;;  %v676_v36 = vpop.f32.mrb[35].mxu1 }
 0x129   :  { %v1356_v37 = vpack.c.bf16 %v513_v29, %v511_v25  ;;  %v1388_v38 = vpack.c.bf16 %v673_v30, %v671_v26  ;;  %v517_v39 = vadd.f32 %v516_v35, %v1667_v47  ;;  %v677_v40 = vadd.f32 %v676_v36, %v1667_v47 }
 0x12b   :  { %1152 = vst.msk [vmem:[%s2124_s3 + $0x80] sm:$0xff] %vm1673_vm3, %v1356_v37  ;;  %1184 = vst.msk [vmem:[%s2124_s3 + $0x180] sm:$0xff] %vm1673_vm3, %v1388_v38  ;;  %v1357_v41 = vpack.c.bf16 %v517_v39, %v515_v33  ;;  %v1389_v42 = vpack.c.bf16 %v677_v40, %v675_v34 }
 0x12d   :  { %1153 = vst.msk [vmem:[%s2124_s3 + $0x88] sm:$0xff] %vm1673_vm3, %v1357_v41  ;;  %1185 = vst.msk [vmem:[%s2124_s3 + $0x188] sm:$0xff] %vm1673_vm3, %v1389_v42  ;;  %v520_v43 = vpop.f32.mrb[36].mxu0  ;;  %v680_v44 = vpop.f32.mrb[36].mxu1 }
 0x12e   :  { %v521_v45 = vadd.f32 %v520_v43, %v1665_v46  ;;  %v681_v48 = vadd.f32 %v680_v44, %v1665_v46  ;;  %v522_v49 = vpop.f32.mrb[37].mxu0  ;;  %v682_v50 = vpop.f32.mrb[37].mxu1 }
 0x12f   :  { %v523_v51 = vadd.f32 %v522_v49, %v1667_v47  ;;  %v683_v52 = vadd.f32 %v682_v50, %v1667_v47  ;;  %v524_v53 = vpop.f32.mrb[38].mxu0  ;;  %v684_v54 = vpop.f32.mrb[38].mxu1 }
 0x130   :  { %v525_v55 = vadd.f32 %v524_v53, %v1665_v46  ;;  %v685_v56 = vadd.f32 %v684_v54, %v1665_v46  ;;  %v526_v57 = vpop.f32.mrb[39].mxu0  ;;  %v686_v59 = vpop.f32.mrb[39].mxu1 }
 0x131   :  { %v1358_v60 = vpack.c.bf16 %v523_v51, %v521_v45  ;;  %v1390_v61 = vpack.c.bf16 %v683_v52, %v681_v48  ;;  %v527_v62 = vadd.f32 %v526_v57, %v1667_v47  ;;  %v687_v63 = vadd.f32 %v686_v59, %v1667_v47 }
 0x133   :  { %1154 = vst.msk [vmem:[%s2124_s3 + $0x90] sm:$0xff] %vm1673_vm3, %v1358_v60  ;;  %1186 = vst.msk [vmem:[%s2124_s3 + $0x190] sm:$0xff] %vm1673_vm3, %v1390_v61  ;;  %v1359_v0 = vpack.c.bf16 %v527_v62, %v525_v55  ;;  %v1391_v1 = vpack.c.bf16 %v687_v63, %v685_v56 }
 0x135   :  { %1155 = vst.msk [vmem:[%s2124_s3 + $0x98] sm:$0xff] %vm1673_vm3, %v1359_v0  ;;  %1187 = vst.msk [vmem:[%s2124_s3 + $0x198] sm:$0xff] %vm1673_vm3, %v1391_v1  ;;  %v530_v2 = vpop.f32.mrb[40].mxu0  ;;  %v690_v3 = vpop.f32.mrb[40].mxu1 }
 0x136   :  { %v531_v4 = vadd.f32 %v530_v2, %v1665_v46  ;;  %v691_v5 = vadd.f32 %v690_v3, %v1665_v46  ;;  %v532_v6 = vpop.f32.mrb[41].mxu0  ;;  %v692_v7 = vpop.f32.mrb[41].mxu1 }
 0x137   :  { %v533_v8 = vadd.f32 %v532_v6, %v1667_v47  ;;  %v693_v9 = vadd.f32 %v692_v7, %v1667_v47  ;;  %v534_v10 = vpop.f32.mrb[42].mxu0  ;;  %v694_v11 = vpop.f32.mrb[42].mxu1 }
 0x138   :  { %v535_v12 = vadd.f32 %v534_v10, %v1665_v46  ;;  %v695_v13 = vadd.f32 %v694_v11, %v1665_v46  ;;  %v536_v14 = vpop.f32.mrb[43].mxu0  ;;  %v696_v15 = vpop.f32.mrb[43].mxu1 }
 0x139   :  { %v1360_v16 = vpack.c.bf16 %v533_v8, %v531_v4  ;;  %v1392_v17 = vpack.c.bf16 %v693_v9, %v691_v5  ;;  %v537_v18 = vadd.f32 %v536_v14, %v1667_v47  ;;  %v697_v19 = vadd.f32 %v696_v15, %v1667_v47 }
 0x13b   :  { %1156 = vst.msk [vmem:[%s2124_s3 + $0xa0] sm:$0xff] %vm1673_vm3, %v1360_v16  ;;  %1188 = vst.msk [vmem:[%s2124_s3 + $0x1a0] sm:$0xff] %vm1673_vm3, %v1392_v17  ;;  %v1361_v20 = vpack.c.bf16 %v537_v18, %v535_v12  ;;  %v1393_v21 = vpack.c.bf16 %v697_v19, %v695_v13 }
 0x13d   :  { %1157 = vst.msk [vmem:[%s2124_s3 + $0xa8] sm:$0xff] %vm1673_vm3, %v1361_v20  ;;  %1189 = vst.msk [vmem:[%s2124_s3 + $0x1a8] sm:$0xff] %vm1673_vm3, %v1393_v21  ;;  %v540_v22 = vpop.f32.mrb[44].mxu0  ;;  %v700_v23 = vpop.f32.mrb[44].mxu1 }
 0x13e   :  { %v541_v24 = vadd.f32 %v540_v22, %v1665_v46  ;;  %v701_v25 = vadd.f32 %v700_v23, %v1665_v46  ;;  %v542_v26 = vpop.f32.mrb[45].mxu0  ;;  %v702_v27 = vpop.f32.mrb[45].mxu1 }
 0x13f   :  { %v543_v28 = vadd.f32 %v542_v26, %v1667_v47  ;;  %v703_v29 = vadd.f32 %v702_v27, %v1667_v47  ;;  %v544_v30 = vpop.f32.mrb[46].mxu0  ;;  %v704_v31 = vpop.f32.mrb[46].mxu1 }
 0x140   :  { %v545_v32 = vadd.f32 %v544_v30, %v1665_v46  ;;  %v705_v33 = vadd.f32 %v704_v31, %v1665_v46  ;;  %v546_v34 = vpop.f32.mrb[47].mxu0  ;;  %v706_v35 = vpop.f32.mrb[47].mxu1 }
 0x141   :  { %v1362_v36 = vpack.c.bf16 %v543_v28, %v541_v24  ;;  %v1394_v37 = vpack.c.bf16 %v703_v29, %v701_v25  ;;  %v547_v38 = vadd.f32 %v546_v34, %v1667_v47  ;;  %v707_v39 = vadd.f32 %v706_v35, %v1667_v47 }
 0x143   :  { %1158 = vst.msk [vmem:[%s2124_s3 + $0xb0] sm:$0xff] %vm1673_vm3, %v1362_v36  ;;  %1190 = vst.msk [vmem:[%s2124_s3 + $0x1b0] sm:$0xff] %vm1673_vm3, %v1394_v37  ;;  %v1363_v40 = vpack.c.bf16 %v547_v38, %v545_v32  ;;  %v1395_v41 = vpack.c.bf16 %v707_v39, %v705_v33 }
 0x145   :  { %1159 = vst.msk [vmem:[%s2124_s3 + $0xb8] sm:$0xff] %vm1673_vm3, %v1363_v40  ;;  %1191 = vst.msk [vmem:[%s2124_s3 + $0x1b8] sm:$0xff] %vm1673_vm3, %v1395_v41  ;;  %v550_v42 = vpop.f32.mrb[48].mxu0  ;;  %v710_v43 = vpop.f32.mrb[48].mxu1 }
 0x146   :  { %v551_v44 = vadd.f32 %v550_v42, %v1665_v46  ;;  %v711_v45 = vadd.f32 %v710_v43, %v1665_v46  ;;  %v552_v48 = vpop.f32.mrb[49].mxu0  ;;  %v712_v49 = vpop.f32.mrb[49].mxu1 }
 0x147   :  { %v553_v50 = vadd.f32 %v552_v48, %v1667_v47  ;;  %v713_v51 = vadd.f32 %v712_v49, %v1667_v47  ;;  %v554_v52 = vpop.f32.mrb[50].mxu0  ;;  %v714_v53 = vpop.f32.mrb[50].mxu1 }
 0x148   :  { %v555_v54 = vadd.f32 %v554_v52, %v1665_v46  ;;  %v715_v55 = vadd.f32 %v714_v53, %v1665_v46  ;;  %v556_v56 = vpop.f32.mrb[51].mxu0  ;;  %v716_v57 = vpop.f32.mrb[51].mxu1 }
 0x149   :  { %v1364_v59 = vpack.c.bf16 %v553_v50, %v551_v44  ;;  %v1396_v60 = vpack.c.bf16 %v713_v51, %v711_v45  ;;  %v557_v61 = vadd.f32 %v556_v56, %v1667_v47  ;;  %v717_v62 = vadd.f32 %v716_v57, %v1667_v47 }
 0x14b   :  { %1160 = vst.msk [vmem:[%s2124_s3 + $0xc0] sm:$0xff] %vm1673_vm3, %v1364_v59  ;;  %1192 = vst.msk [vmem:[%s2124_s3 + $0x1c0] sm:$0xff] %vm1673_vm3, %v1396_v60  ;;  %v1365_v63 = vpack.c.bf16 %v557_v61, %v555_v54  ;;  %v1397_v0 = vpack.c.bf16 %v717_v62, %v715_v55 }
 0x14d   :  { %1161 = vst.msk [vmem:[%s2124_s3 + $0xc8] sm:$0xff] %vm1673_vm3, %v1365_v63  ;;  %1193 = vst.msk [vmem:[%s2124_s3 + $0x1c8] sm:$0xff] %vm1673_vm3, %v1397_v0  ;;  %v560_v1 = vpop.f32.mrb[52].mxu0  ;;  %v720_v2 = vpop.f32.mrb[52].mxu1 }
 0x14e   :  { %v561_v3 = vadd.f32 %v560_v1, %v1665_v46  ;;  %v721_v4 = vadd.f32 %v720_v2, %v1665_v46  ;;  %v562_v5 = vpop.f32.mrb[53].mxu0  ;;  %v722_v6 = vpop.f32.mrb[53].mxu1 }
 0x14f   :  { %v563_v7 = vadd.f32 %v562_v5, %v1667_v47  ;;  %v723_v8 = vadd.f32 %v722_v6, %v1667_v47  ;;  %v564_v9 = vpop.f32.mrb[54].mxu0  ;;  %v724_v10 = vpop.f32.mrb[54].mxu1 }
 0x150   :  { %v565_v11 = vadd.f32 %v564_v9, %v1665_v46  ;;  %v725_v12 = vadd.f32 %v724_v10, %v1665_v46  ;;  %v566_v13 = vpop.f32.mrb[55].mxu0  ;;  %v726_v14 = vpop.f32.mrb[55].mxu1 }
 0x151   :  { %v1366_v15 = vpack.c.bf16 %v563_v7, %v561_v3  ;;  %v1398_v16 = vpack.c.bf16 %v723_v8, %v721_v4  ;;  %v567_v17 = vadd.f32 %v566_v13, %v1667_v47  ;;  %v727_v18 = vadd.f32 %v726_v14, %v1667_v47 }
 0x153   :  { %1162 = vst.msk [vmem:[%s2124_s3 + $0xd0] sm:$0xff] %vm1673_vm3, %v1366_v15  ;;  %1194 = vst.msk [vmem:[%s2124_s3 + $0x1d0] sm:$0xff] %vm1673_vm3, %v1398_v16  ;;  %v1367_v19 = vpack.c.bf16 %v567_v17, %v565_v11  ;;  %v1399_v20 = vpack.c.bf16 %v727_v18, %v725_v12 }
 0x155   :  { %1163 = vst.msk [vmem:[%s2124_s3 + $0xd8] sm:$0xff] %vm1673_vm3, %v1367_v19  ;;  %1195 = vst.msk [vmem:[%s2124_s3 + $0x1d8] sm:$0xff] %vm1673_vm3, %v1399_v20  ;;  %v570_v21 = vpop.f32.mrb[56].mxu0  ;;  %v730_v22 = vpop.f32.mrb[56].mxu1 }
 0x156   :  { %v571_v23 = vadd.f32 %v570_v21, %v1665_v46  ;;  %v731_v24 = vadd.f32 %v730_v22, %v1665_v46  ;;  %v572_v25 = vpop.f32.mrb[57].mxu0  ;;  %v732_v26 = vpop.f32.mrb[57].mxu1 }
 0x157   :  { %v573_v27 = vadd.f32 %v572_v25, %v1667_v47  ;;  %v733_v28 = vadd.f32 %v732_v26, %v1667_v47  ;;  %v574_v29 = vpop.f32.mrb[58].mxu0  ;;  %v734_v30 = vpop.f32.mrb[58].mxu1 }
 0x158   :  { %v575_v31 = vadd.f32 %v574_v29, %v1665_v46  ;;  %v735_v32 = vadd.f32 %v734_v30, %v1665_v46  ;;  %v576_v33 = vpop.f32.mrb[59].mxu0  ;;  %v736_v34 = vpop.f32.mrb[59].mxu1 }
 0x159   :  { %v1368_v35 = vpack.c.bf16 %v573_v27, %v571_v23  ;;  %v1400_v36 = vpack.c.bf16 %v733_v28, %v731_v24  ;;  %v577_v37 = vadd.f32 %v576_v33, %v1667_v47  ;;  %v737_v38 = vadd.f32 %v736_v34, %v1667_v47 }
 0x15b   :  { %1164 = vst.msk [vmem:[%s2124_s3 + $0xe0] sm:$0xff] %vm1673_vm3, %v1368_v35  ;;  %1196 = vst.msk [vmem:[%s2124_s3 + $0x1e0] sm:$0xff] %vm1673_vm3, %v1400_v36  ;;  %v1369_v39 = vpack.c.bf16 %v577_v37, %v575_v31  ;;  %v1401_v40 = vpack.c.bf16 %v737_v38, %v735_v32 }
 0x15d   :  { %1165 = vst.msk [vmem:[%s2124_s3 + $0xe8] sm:$0xff] %vm1673_vm3, %v1369_v39  ;;  %1197 = vst.msk [vmem:[%s2124_s3 + $0x1e8] sm:$0xff] %vm1673_vm3, %v1401_v40  ;;  %v580_v41 = vpop.f32.mrb[60].mxu0  ;;  %v740_v42 = vpop.f32.mrb[60].mxu1 }
 0x15e   :  { %v581_v43 = vadd.f32 %v580_v41, %v1665_v46  ;;  %v741_v44 = vadd.f32 %v740_v42, %v1665_v46  ;;  %v582_v45 = vpop.f32.mrb[61].mxu0  ;;  %v742_v48 = vpop.f32.mrb[61].mxu1 }
 0x15f   :  { %v583_v49 = vadd.f32 %v582_v45, %v1667_v47  ;;  %v743_v50 = vadd.f32 %v742_v48, %v1667_v47  ;;  %v584_v51 = vpop.f32.mrb[62].mxu0  ;;  %v744_v52 = vpop.f32.mrb[62].mxu1 }
 0x160   :  { %v585_v53 = vadd.f32 %v584_v51, %v1665_v46  ;;  %v745_v54 = vadd.f32 %v744_v52, %v1665_v46  ;;  %v586_v55 = vpop.f32.mrb[63].mxu0  ;;  %v746_v56 = vpop.f32.mrb[63].mxu1 }
 0x161   :  { %v1370_v57 = vpack.c.bf16 %v583_v49, %v581_v43  ;;  %v1402_v59 = vpack.c.bf16 %v743_v50, %v741_v44  ;;  %v587_v60 = vadd.f32 %v586_v55, %v1667_v47  ;;  %v747_v61 = vadd.f32 %v746_v56, %v1667_v47 }
 0x163   :  { %1166 = vst.msk [vmem:[%s2124_s3 + $0xf0] sm:$0xff] %vm1673_vm3, %v1370_v57  ;;  %1198 = vst.msk [vmem:[%s2124_s3 + $0x1f0] sm:$0xff] %vm1673_vm3, %v1402_v59  ;;  %v1371_v46 = vpack.c.bf16 %v587_v60, %v585_v53  ;;  %v1403_v62 = vpack.c.bf16 %v747_v61, %v745_v54 }
 0x165   :  { %1167 = vst.msk [vmem:[%s2124_s3 + $0xf8] sm:$0xff] %vm1673_vm3, %v1371_v46  ;;  %1199 = vst.msk [vmem:[%s2124_s3 + $0x1f8] sm:$0xff] %vm1673_vm3, %v1403_v62 }

</bundles_post_ra>
